<compile_context>
chip_gen: v7x
topology: tpu7x:2x2x1
jax: 0.10.0
libtpu: 0.0.40
codegen_flags: <defaults>
</compile_context>

<pallas_src>
import functools

import jax
import jax.numpy as jnp
from jax.experimental import pallas as pl
from jax.experimental.pallas import tpu as pltpu


def _can_nest(sizes, H, W):
    """True when coarse levels can be derived from the finest level's cells."""
    s_max = max(sizes)
    if s_max <= 0 or (H % s_max) or (W % s_max):
        return False
    return all(s > 0 and s_max % s == 0 for s in sizes)


def _spp_kernel(x_ref, o_ref, *, output_sizes):
    # x_ref: (bb, Ct, H, W) NCHW block -- W on lanes, H on sublanes.
    # o_ref: (bb, Ct, total_cells), cell index within a level = i*s + j,
    #        levels laid out contiguously in `output_sizes` order.
    _, _, H, W = x_ref.shape
    sizes = tuple(output_sizes)

    if _can_nest(sizes, H, W):
        s_max = max(sizes)
        kh, kw = H // s_max, W // s_max
        # Finest-level cell maxes, computed once for the whole block.
        fine = []                                           # fine[i][j]: (bb, Ct, 1)
        for i in range(s_max):
            band = jnp.max(x_ref[:, :, i * kh:(i + 1) * kh, :], axis=2)   # (bb,Ct,W)
            fine.append([
                jnp.max(band[:, :, j * kw:(j + 1) * kw], axis=-1, keepdims=True)
                for j in range(s_max)
            ])
        # Every requested level = max over groups of finest cells (VPU only).
        off = 0
        for s in sizes:
            r = s_max // s
            for i in range(s):
                for j in range(s):
                    acc = fine[i * r][j * r]
                    for di in range(r):
                        for dj in range(r):
                            if di or dj:
                                acc = jnp.maximum(acc, fine[i * r + di][j * r + dj])
                    k = off + i * s + j
                    o_ref[:, :, k:k + 1] = acc              # direct per-cell store
            off += s * s
    else:
        # General AdaptiveMaxPool2d windows: [floor(i*H/s), ceil((i+1)*H/s)).
        # H-bands are cached and reused across levels sharing boundaries.
        band_cache = {}
        off = 0
        for s in sizes:
            for i in range(s):
                h0 = (i * H) // s
                h1 = -(-(i + 1) * H // s)
                key = (h0, h1)
                if key not in band_cache:
                    band_cache[key] = jnp.max(x_ref[:, :, h0:h1, :], axis=2)
                band = band_cache[key]                       # (bb, Ct, W)
                for j in range(s):
                    w0 = (j * W) // s
                    w1 = -(-(j + 1) * W // s)
                    cell = jnp.max(band[:, :, w0:w1], axis=-1, keepdims=True)
                    k = off + i * s + j
                    o_ref[:, :, k:k + 1] = cell
            off += s * s


def _vmem_capacity_bytes(default=64 << 20):
    try:
        info = pltpu.get_tpu_info()
        cap = getattr(info, "vmem_capacity_bytes", None)
        if cap:
            return int(cap)
    except Exception:
        pass
    return default  # conservative: v7x per-TC physical VMEM


def spatial_pyramid_pooling(x, output_sizes):
    """x: (B, C, H, W) NCHW  ->  (B, C * sum(s*s)) in torch's SPP ordering."""
    B, C, H, W = x.shape
    sizes = tuple(int(s) for s in output_sizes)
    total_cells = sum(s * s for s in sizes)
    itemsize = jnp.dtype(x.dtype).itemsize

    # --- Per-generation block sizing -------------------------------------
    vmem_cap = _vmem_capacity_bytes()
    # ~12 MiB input blocks (review: v7x 12-20 MiB, v6e 8-24 MiB), scaled down
    # if the chip reports a small VMEM.
    target = max(1 << 20, min(12 << 20, vmem_cap // 5))

    plane_bytes = H * W * itemsize
    per_sample = C * plane_bytes

    if per_sample <= target:
        ct = C
        bb = max(1, min(B, target // per_sample))
    else:
        # One sample per step is already big -> tile channels instead.
        bb = 1
        max_ch = max(1, target // plane_bytes)
        if max_ch >= C:
            ct = C
        else:
            q = 128 if C >= 128 else 8            # keep sublane rule + dense DMAs
            ct = min(C, max(q, (max_ch // q) * q))
            if ct % 8 != 0 and ct != C:           # guard for tiny, odd C
                ct = C

    # Megacore: when channels aren't tiled, keep >= 2 programs on the batch
    # axis so both TensorCores get work.
    if ct == C and B >= 2:
        bb = min(bb, -(-B // 2))

    grid_b = -(-B // bb)
    grid_c = -(-C // ct)
    # Megacore at B == 1: split channels across cores when it is worthwhile.
    if grid_b * grid_c == 1 and C >= 256:
        ct = min(C, ((-(-C // 2)) + 127) // 128 * 128)
        grid_c = -(-C // ct)

    # Explicit VMEM limit (defaults: 16 MiB v5e, 32 MiB v6e/v7x scoped).
    in_block_bytes = bb * ct * H * W * itemsize
    out_block_bytes = bb * ct * max(total_cells, 128) * itemsize
    vmem_need = 2 * (in_block_bytes + out_block_bytes) + (4 << 20)
    vmem_limit = int(min(max(vmem_need, 32 << 20), int(vmem_cap * 0.9)))

    # Note: when B % bb != 0 or C % ct != 0 the last blocks are clamped by
    # Pallas (overlapping re-reads / re-writes). That is correct here because
    # every output element is computed independently (idempotent writes).
    flops = B * C * H * W * len(sizes)            # ~one compare per elem per level
    bytes_accessed = (B * C * H * W + B * C * total_cells) * itemsize

    out = pl.pallas_call(
        functools.partial(_spp_kernel, output_sizes=sizes),
        out_shape=jax.ShapeDtypeStruct((B, C, total_cells), x.dtype),
        grid=(grid_b, grid_c),
        in_specs=[pl.BlockSpec((bb, ct, H, W), lambda b, c: (b, c, 0, 0))],
        out_specs=pl.BlockSpec((bb, ct, total_cells), lambda b, c: (b, c, 0)),
        compiler_params=pltpu.CompilerParams(
            dimension_semantics=("parallel", "parallel"),
            vmem_limit_bytes=vmem_limit),
        cost_estimate=pl.CostEstimate(
            flops=flops, transcendentals=0, bytes_accessed=bytes_accessed),
    )(x)

    # Reorder to torch's flattening: per level, (B, C, s*s) -> (B, C*s*s)
    # (index c*s*s + i*s + j), then concat levels. Pure reshape/concat on the
    # tiny pooled tensor -- no transpose of the big input anywhere.
    chunks, off = [], 0
    for s in sizes:
        chunks.append(out[:, :, off:off + s * s].reshape(B, C * s * s))
        off += s * s
    return chunks[0] if len(chunks) == 1 else jnp.concatenate(chunks, axis=1)


def _spp_reference(x, output_sizes):
    """Pure-JAX reference mirroring torch AdaptiveMaxPool2d + view + cat."""
    B, C, H, W = x.shape
    feats = []
    for s in output_sizes:
        pooled = jnp.zeros((B, C, s, s), dtype=x.dtype)
        for i in range(s):
            h0, h1 = (i * H) // s, -(-(i + 1) * H // s)
            for j in range(s):
                w0, w1 = (j * W) // s, -(-(j + 1) * W // s)
                m = jnp.max(x[:, :, h0:h1, w0:w1], axis=(2, 3))
                pooled = pooled.at[:, :, i, j].set(m)
        feats.append(pooled.reshape(B, -1))
    return jnp.concatenate(feats, axis=1)


if __name__ == "__main__":
    key = jax.random.PRNGKey(0)

    # Main case (matches the module spec): SpatialPyramidPooling([1, 2, 4]).
    output_sizes = (1, 2, 4)
    x = jax.random.normal(key, (2, 4, 16, 16), dtype=jnp.float32)       # NCHW
    y = jax.block_until_ready(spatial_pyramid_pooling(x, output_sizes))
    y_ref = _spp_reference(x, output_sizes)
    assert y.shape == (2, 4 * (1 + 4 + 16)), y.shape
    assert jnp.allclose(y, y_ref), "Pallas SPP mismatch vs reference (nested path)"

    # Non-divisible spatial dims exercise the general (non-nested) path.
    output_sizes2 = (1, 3)
    x2 = jax.random.normal(jax.random.PRNGKey(0), (2, 6, 10, 10), dtype=jnp.float32)
    y2 = jax.block_until_ready(spatial_pyramid_pooling(x2, output_sizes2))
    y2_ref = _spp_reference(x2, output_sizes2)
    assert y2.shape == (2, 6 * (1 + 9)), y2.shape
    assert jnp.allclose(y2, y2_ref), "Pallas SPP mismatch vs reference (general path)"

    print("KERNEL_OK")
</pallas_src>

<mosaic_0001>
module attributes {stable_mosaic.version = 11 : i64} {
  func.func @_spp_kernel(%arg0: i32, %arg1: i32, %arg2: memref<1x4x16x16xf32, #tpu.memory_space<vmem>>, %arg3: memref<1x4x21xf32, #tpu.memory_space<vmem>>) attributes {dimension_semantics = [#tpu.dimension_semantics<parallel>, #tpu.dimension_semantics<parallel>], iteration_bounds = array<i64: 2, 1>, scalar_prefetch = 0 : i64, scratch_operands = 0 : i64, tpu.core_type = #tpu.core_type<tc>, window_params = [{transform_indices = @transform_0, window_bounds = array<i64: 1, 4, 16, 16>}, {transform_indices = @transform_1, window_bounds = array<i64: 1, 4, 21>}]} {
    %c0 = arith.constant 0 : index
    %c0_0 = arith.constant 0 : index
    %c0_1 = arith.constant 0 : index
    %c0_2 = arith.constant 0 : index
    %0 = vector.load %arg2[%c0, %c0_0, %c0_1, %c0_2] : memref<1x4x16x16xf32, #tpu.memory_space<vmem>>, vector<1x4x4x16xf32>
    %cst = arith.constant dense<0xFF800000> : vector<1x4x16xf32>
    %1 = vector.multi_reduction <maximumf>, %0, %cst [2] : vector<1x4x4x16xf32> to vector<1x4x16xf32>
    %2 = vector.extract_strided_slice %1 {offsets = [0, 0, 0], sizes = [1, 4, 4], strides = [1, 1, 1]} : vector<1x4x16xf32> to vector<1x4x4xf32>
    %cst_3 = arith.constant dense<0xFF800000> : vector<1x4xf32>
    %3 = vector.multi_reduction <maximumf>, %2, %cst_3 [2] : vector<1x4x4xf32> to vector<1x4xf32>
    %4 = vector.shape_cast %3 : vector<1x4xf32> to vector<1x4x1xf32>
    %5 = vector.extract_strided_slice %1 {offsets = [0, 0, 4], sizes = [1, 4, 4], strides = [1, 1, 1]} : vector<1x4x16xf32> to vector<1x4x4xf32>
    %cst_4 = arith.constant dense<0xFF800000> : vector<1x4xf32>
    %6 = vector.multi_reduction <maximumf>, %5, %cst_4 [2] : vector<1x4x4xf32> to vector<1x4xf32>
    %7 = vector.shape_cast %6 : vector<1x4xf32> to vector<1x4x1xf32>
    %8 = vector.extract_strided_slice %1 {offsets = [0, 0, 8], sizes = [1, 4, 4], strides = [1, 1, 1]} : vector<1x4x16xf32> to vector<1x4x4xf32>
    %cst_5 = arith.constant dense<0xFF800000> : vector<1x4xf32>
    %9 = vector.multi_reduction <maximumf>, %8, %cst_5 [2] : vector<1x4x4xf32> to vector<1x4xf32>
    %10 = vector.shape_cast %9 : vector<1x4xf32> to vector<1x4x1xf32>
    %11 = vector.extract_strided_slice %1 {offsets = [0, 0, 12], sizes = [1, 4, 4], strides = [1, 1, 1]} : vector<1x4x16xf32> to vector<1x4x4xf32>
    %cst_6 = arith.constant dense<0xFF800000> : vector<1x4xf32>
    %12 = vector.multi_reduction <maximumf>, %11, %cst_6 [2] : vector<1x4x4xf32> to vector<1x4xf32>
    %13 = vector.shape_cast %12 : vector<1x4xf32> to vector<1x4x1xf32>
    %c0_7 = arith.constant 0 : index
    %c0_8 = arith.constant 0 : index
    %c4 = arith.constant 4 : index
    %c0_9 = arith.constant 0 : index
    %14 = vector.load %arg2[%c0_7, %c0_8, %c4, %c0_9] : memref<1x4x16x16xf32, #tpu.memory_space<vmem>>, vector<1x4x4x16xf32>
    %cst_10 = arith.constant dense<0xFF800000> : vector<1x4x16xf32>
    %15 = vector.multi_reduction <maximumf>, %14, %cst_10 [2] : vector<1x4x4x16xf32> to vector<1x4x16xf32>
    %16 = vector.extract_strided_slice %15 {offsets = [0, 0, 0], sizes = [1, 4, 4], strides = [1, 1, 1]} : vector<1x4x16xf32> to vector<1x4x4xf32>
    %cst_11 = arith.constant dense<0xFF800000> : vector<1x4xf32>
    %17 = vector.multi_reduction <maximumf>, %16, %cst_11 [2] : vector<1x4x4xf32> to vector<1x4xf32>
    %18 = vector.shape_cast %17 : vector<1x4xf32> to vector<1x4x1xf32>
    %19 = vector.extract_strided_slice %15 {offsets = [0, 0, 4], sizes = [1, 4, 4], strides = [1, 1, 1]} : vector<1x4x16xf32> to vector<1x4x4xf32>
    %cst_12 = arith.constant dense<0xFF800000> : vector<1x4xf32>
    %20 = vector.multi_reduction <maximumf>, %19, %cst_12 [2] : vector<1x4x4xf32> to vector<1x4xf32>
    %21 = vector.shape_cast %20 : vector<1x4xf32> to vector<1x4x1xf32>
    %22 = vector.extract_strided_slice %15 {offsets = [0, 0, 8], sizes = [1, 4, 4], strides = [1, 1, 1]} : vector<1x4x16xf32> to vector<1x4x4xf32>
    %cst_13 = arith.constant dense<0xFF800000> : vector<1x4xf32>
    %23 = vector.multi_reduction <maximumf>, %22, %cst_13 [2] : vector<1x4x4xf32> to vector<1x4xf32>
    %24 = vector.shape_cast %23 : vector<1x4xf32> to vector<1x4x1xf32>
    %25 = vector.extract_strided_slice %15 {offsets = [0, 0, 12], sizes = [1, 4, 4], strides = [1, 1, 1]} : vector<1x4x16xf32> to vector<1x4x4xf32>
    %cst_14 = arith.constant dense<0xFF800000> : vector<1x4xf32>
    %26 = vector.multi_reduction <maximumf>, %25, %cst_14 [2] : vector<1x4x4xf32> to vector<1x4xf32>
    %27 = vector.shape_cast %26 : vector<1x4xf32> to vector<1x4x1xf32>
    %c0_15 = arith.constant 0 : index
    %c0_16 = arith.constant 0 : index
    %c8 = arith.constant 8 : index
    %c0_17 = arith.constant 0 : index
    %28 = vector.load %arg2[%c0_15, %c0_16, %c8, %c0_17] : memref<1x4x16x16xf32, #tpu.memory_space<vmem>>, vector<1x4x4x16xf32>
    %cst_18 = arith.constant dense<0xFF800000> : vector<1x4x16xf32>
    %29 = vector.multi_reduction <maximumf>, %28, %cst_18 [2] : vector<1x4x4x16xf32> to vector<1x4x16xf32>
    %30 = vector.extract_strided_slice %29 {offsets = [0, 0, 0], sizes = [1, 4, 4], strides = [1, 1, 1]} : vector<1x4x16xf32> to vector<1x4x4xf32>
    %cst_19 = arith.constant dense<0xFF800000> : vector<1x4xf32>
    %31 = vector.multi_reduction <maximumf>, %30, %cst_19 [2] : vector<1x4x4xf32> to vector<1x4xf32>
    %32 = vector.shape_cast %31 : vector<1x4xf32> to vector<1x4x1xf32>
    %33 = vector.extract_strided_slice %29 {offsets = [0, 0, 4], sizes = [1, 4, 4], strides = [1, 1, 1]} : vector<1x4x16xf32> to vector<1x4x4xf32>
    %cst_20 = arith.constant dense<0xFF800000> : vector<1x4xf32>
    %34 = vector.multi_reduction <maximumf>, %33, %cst_20 [2] : vector<1x4x4xf32> to vector<1x4xf32>
    %35 = vector.shape_cast %34 : vector<1x4xf32> to vector<1x4x1xf32>
    %36 = vector.extract_strided_slice %29 {offsets = [0, 0, 8], sizes = [1, 4, 4], strides = [1, 1, 1]} : vector<1x4x16xf32> to vector<1x4x4xf32>
    %cst_21 = arith.constant dense<0xFF800000> : vector<1x4xf32>
    %37 = vector.multi_reduction <maximumf>, %36, %cst_21 [2] : vector<1x4x4xf32> to vector<1x4xf32>
    %38 = vector.shape_cast %37 : vector<1x4xf32> to vector<1x4x1xf32>
    %39 = vector.extract_strided_slice %29 {offsets = [0, 0, 12], sizes = [1, 4, 4], strides = [1, 1, 1]} : vector<1x4x16xf32> to vector<1x4x4xf32>
    %cst_22 = arith.constant dense<0xFF800000> : vector<1x4xf32>
    %40 = vector.multi_reduction <maximumf>, %39, %cst_22 [2] : vector<1x4x4xf32> to vector<1x4xf32>
    %41 = vector.shape_cast %40 : vector<1x4xf32> to vector<1x4x1xf32>
    %c0_23 = arith.constant 0 : index
    %c0_24 = arith.constant 0 : index
    %c12 = arith.constant 12 : index
    %c0_25 = arith.constant 0 : index
    %42 = vector.load %arg2[%c0_23, %c0_24, %c12, %c0_25] : memref<1x4x16x16xf32, #tpu.memory_space<vmem>>, vector<1x4x4x16xf32>
    %cst_26 = arith.constant dense<0xFF800000> : vector<1x4x16xf32>
    %43 = vector.multi_reduction <maximumf>, %42, %cst_26 [2] : vector<1x4x4x16xf32> to vector<1x4x16xf32>
    %44 = vector.extract_strided_slice %43 {offsets = [0, 0, 0], sizes = [1, 4, 4], strides = [1, 1, 1]} : vector<1x4x16xf32> to vector<1x4x4xf32>
    %cst_27 = arith.constant dense<0xFF800000> : vector<1x4xf32>
    %45 = vector.multi_reduction <maximumf>, %44, %cst_27 [2] : vector<1x4x4xf32> to vector<1x4xf32>
    %46 = vector.shape_cast %45 : vector<1x4xf32> to vector<1x4x1xf32>
    %47 = vector.extract_strided_slice %43 {offsets = [0, 0, 4], sizes = [1, 4, 4], strides = [1, 1, 1]} : vector<1x4x16xf32> to vector<1x4x4xf32>
    %cst_28 = arith.constant dense<0xFF800000> : vector<1x4xf32>
    %48 = vector.multi_reduction <maximumf>, %47, %cst_28 [2] : vector<1x4x4xf32> to vector<1x4xf32>
    %49 = vector.shape_cast %48 : vector<1x4xf32> to vector<1x4x1xf32>
    %50 = vector.extract_strided_slice %43 {offsets = [0, 0, 8], sizes = [1, 4, 4], strides = [1, 1, 1]} : vector<1x4x16xf32> to vector<1x4x4xf32>
    %cst_29 = arith.constant dense<0xFF800000> : vector<1x4xf32>
    %51 = vector.multi_reduction <maximumf>, %50, %cst_29 [2] : vector<1x4x4xf32> to vector<1x4xf32>
    %52 = vector.shape_cast %51 : vector<1x4xf32> to vector<1x4x1xf32>
    %53 = vector.extract_strided_slice %43 {offsets = [0, 0, 12], sizes = [1, 4, 4], strides = [1, 1, 1]} : vector<1x4x16xf32> to vector<1x4x4xf32>
    %cst_30 = arith.constant dense<0xFF800000> : vector<1x4xf32>
    %54 = vector.multi_reduction <maximumf>, %53, %cst_30 [2] : vector<1x4x4xf32> to vector<1x4xf32>
    %55 = vector.shape_cast %54 : vector<1x4xf32> to vector<1x4x1xf32>
    %56 = arith.maximumf %4, %7 : vector<1x4x1xf32>
    %57 = arith.maximumf %56, %10 : vector<1x4x1xf32>
    %58 = arith.maximumf %57, %13 : vector<1x4x1xf32>
    %59 = arith.maximumf %58, %18 : vector<1x4x1xf32>
    %60 = arith.maximumf %59, %21 : vector<1x4x1xf32>
    %61 = arith.maximumf %60, %24 : vector<1x4x1xf32>
    %62 = arith.maximumf %61, %27 : vector<1x4x1xf32>
    %63 = arith.maximumf %62, %32 : vector<1x4x1xf32>
    %64 = arith.maximumf %63, %35 : vector<1x4x1xf32>
    %65 = arith.maximumf %64, %38 : vector<1x4x1xf32>
    %66 = arith.maximumf %65, %41 : vector<1x4x1xf32>
    %67 = arith.maximumf %66, %46 : vector<1x4x1xf32>
    %68 = arith.maximumf %67, %49 : vector<1x4x1xf32>
    %69 = arith.maximumf %68, %52 : vector<1x4x1xf32>
    %70 = arith.maximumf %69, %55 : vector<1x4x1xf32>
    %c0_31 = arith.constant 0 : index
    %c0_32 = arith.constant 0 : index
    %c0_33 = arith.constant 0 : index
    %71 = vector.load %arg3[%c0_31, %c0_32, %c0_33] : memref<1x4x21xf32, #tpu.memory_space<vmem>>, vector<1x4x1xf32>
    tpu.vector_store %arg3[%c0_31, %c0_32, %c0_33], %70 {strides = array<i32>} : memref<1x4x21xf32, #tpu.memory_space<vmem>>, vector<1x4x1xf32>,
    %72 = arith.maximumf %4, %7 : vector<1x4x1xf32>
    %73 = arith.maximumf %72, %18 : vector<1x4x1xf32>
    %74 = arith.maximumf %73, %21 : vector<1x4x1xf32>
    %c0_34 = arith.constant 0 : index
    %c0_35 = arith.constant 0 : index
    %c1 = arith.constant 1 : index
    %75 = vector.load %arg3[%c0_34, %c0_35, %c1] : memref<1x4x21xf32, #tpu.memory_space<vmem>>, vector<1x4x1xf32>
    tpu.vector_store %arg3[%c0_34, %c0_35, %c1], %74 {strides = array<i32>} : memref<1x4x21xf32, #tpu.memory_space<vmem>>, vector<1x4x1xf32>,
    %76 = arith.maximumf %10, %13 : vector<1x4x1xf32>
    %77 = arith.maximumf %76, %24 : vector<1x4x1xf32>
    %78 = arith.maximumf %77, %27 : vector<1x4x1xf32>
    %c0_36 = arith.constant 0 : index
    %c0_37 = arith.constant 0 : index
    %c2 = arith.constant 2 : index
    %79 = vector.load %arg3[%c0_36, %c0_37, %c2] : memref<1x4x21xf32, #tpu.memory_space<vmem>>, vector<1x4x1xf32>
    tpu.vector_store %arg3[%c0_36, %c0_37, %c2], %78 {strides = array<i32>} : memref<1x4x21xf32, #tpu.memory_space<vmem>>, vector<1x4x1xf32>,
    %80 = arith.maximumf %32, %35 : vector<1x4x1xf32>
    %81 = arith.maximumf %80, %46 : vector<1x4x1xf32>
    %82 = arith.maximumf %81, %49 : vector<1x4x1xf32>
    %c0_38 = arith.constant 0 : index
    %c0_39 = arith.constant 0 : index
    %c3 = arith.constant 3 : index
    %83 = vector.load %arg3[%c0_38, %c0_39, %c3] : memref<1x4x21xf32, #tpu.memory_space<vmem>>, vector<1x4x1xf32>
    tpu.vector_store %arg3[%c0_38, %c0_39, %c3], %82 {strides = array<i32>} : memref<1x4x21xf32, #tpu.memory_space<vmem>>, vector<1x4x1xf32>,
    %84 = arith.maximumf %38, %41 : vector<1x4x1xf32>
    %85 = arith.maximumf %84, %52 : vector<1x4x1xf32>
    %86 = arith.maximumf %85, %55 : vector<1x4x1xf32>
    %c0_40 = arith.constant 0 : index
    %c0_41 = arith.constant 0 : index
    %c4_42 = arith.constant 4 : index
    %87 = vector.load %arg3[%c0_40, %c0_41, %c4_42] : memref<1x4x21xf32, #tpu.memory_space<vmem>>, vector<1x4x1xf32>
    tpu.vector_store %arg3[%c0_40, %c0_41, %c4_42], %86 {strides = array<i32>} : memref<1x4x21xf32, #tpu.memory_space<vmem>>, vector<1x4x1xf32>,
    %c0_43 = arith.constant 0 : index
    %c0_44 = arith.constant 0 : index
    %c5 = arith.constant 5 : index
    %88 = vector.load %arg3[%c0_43, %c0_44, %c5] : memref<1x4x21xf32, #tpu.memory_space<vmem>>, vector<1x4x1xf32>
    tpu.vector_store %arg3[%c0_43, %c0_44, %c5], %4 {strides = array<i32>} : memref<1x4x21xf32, #tpu.memory_space<vmem>>, vector<1x4x1xf32>,
    %c0_45 = arith.constant 0 : index
    %c0_46 = arith.constant 0 : index
    %c6 = arith.constant 6 : index
    %89 = vector.load %arg3[%c0_45, %c0_46, %c6] : memref<1x4x21xf32, #tpu.memory_space<vmem>>, vector<1x4x1xf32>
    tpu.vector_store %arg3[%c0_45, %c0_46, %c6], %7 {strides = array<i32>} : memref<1x4x21xf32, #tpu.memory_space<vmem>>, vector<1x4x1xf32>,
    %c0_47 = arith.constant 0 : index
    %c0_48 = arith.constant 0 : index
    %c7 = arith.constant 7 : index
    %90 = vector.load %arg3[%c0_47, %c0_48, %c7] : memref<1x4x21xf32, #tpu.memory_space<vmem>>, vector<1x4x1xf32>
    tpu.vector_store %arg3[%c0_47, %c0_48, %c7], %10 {strides = array<i32>} : memref<1x4x21xf32, #tpu.memory_space<vmem>>, vector<1x4x1xf32>,
    %c0_49 = arith.constant 0 : index
    %c0_50 = arith.constant 0 : index
    %c8_51 = arith.constant 8 : index
    %91 = vector.load %arg3[%c0_49, %c0_50, %c8_51] : memref<1x4x21xf32, #tpu.memory_space<vmem>>, vector<1x4x1xf32>
    tpu.vector_store %arg3[%c0_49, %c0_50, %c8_51], %13 {strides = array<i32>} : memref<1x4x21xf32, #tpu.memory_space<vmem>>, vector<1x4x1xf32>,
    %c0_52 = arith.constant 0 : index
    %c0_53 = arith.constant 0 : index
    %c9 = arith.constant 9 : index
    %92 = vector.load %arg3[%c0_52, %c0_53, %c9] : memref<1x4x21xf32, #tpu.memory_space<vmem>>, vector<1x4x1xf32>
    tpu.vector_store %arg3[%c0_52, %c0_53, %c9], %18 {strides = array<i32>} : memref<1x4x21xf32, #tpu.memory_space<vmem>>, vector<1x4x1xf32>,
    %c0_54 = arith.constant 0 : index
    %c0_55 = arith.constant 0 : index
    %c10 = arith.constant 10 : index
    %93 = vector.load %arg3[%c0_54, %c0_55, %c10] : memref<1x4x21xf32, #tpu.memory_space<vmem>>, vector<1x4x1xf32>
    tpu.vector_store %arg3[%c0_54, %c0_55, %c10], %21 {strides = array<i32>} : memref<1x4x21xf32, #tpu.memory_space<vmem>>, vector<1x4x1xf32>,
    %c0_56 = arith.constant 0 : index
    %c0_57 = arith.constant 0 : index
    %c11 = arith.constant 11 : index
    %94 = vector.load %arg3[%c0_56, %c0_57, %c11] : memref<1x4x21xf32, #tpu.memory_space<vmem>>, vector<1x4x1xf32>
    tpu.vector_store %arg3[%c0_56, %c0_57, %c11], %24 {strides = array<i32>} : memref<1x4x21xf32, #tpu.memory_space<vmem>>, vector<1x4x1xf32>,
    %c0_58 = arith.constant 0 : index
    %c0_59 = arith.constant 0 : index
    %c12_60 = arith.constant 12 : index
    %95 = vector.load %arg3[%c0_58, %c0_59, %c12_60] : memref<1x4x21xf32, #tpu.memory_space<vmem>>, vector<1x4x1xf32>
    tpu.vector_store %arg3[%c0_58, %c0_59, %c12_60], %27 {strides = array<i32>} : memref<1x4x21xf32, #tpu.memory_space<vmem>>, vector<1x4x1xf32>,
    %c0_61 = arith.constant 0 : index
    %c0_62 = arith.constant 0 : index
    %c13 = arith.constant 13 : index
    %96 = vector.load %arg3[%c0_61, %c0_62, %c13] : memref<1x4x21xf32, #tpu.memory_space<vmem>>, vector<1x4x1xf32>
    tpu.vector_store %arg3[%c0_61, %c0_62, %c13], %32 {strides = array<i32>} : memref<1x4x21xf32, #tpu.memory_space<vmem>>, vector<1x4x1xf32>,
    %c0_63 = arith.constant 0 : index
    %c0_64 = arith.constant 0 : index
    %c14 = arith.constant 14 : index
    %97 = vector.load %arg3[%c0_63, %c0_64, %c14] : memref<1x4x21xf32, #tpu.memory_space<vmem>>, vector<1x4x1xf32>
    tpu.vector_store %arg3[%c0_63, %c0_64, %c14], %35 {strides = array<i32>} : memref<1x4x21xf32, #tpu.memory_space<vmem>>, vector<1x4x1xf32>,
    %c0_65 = arith.constant 0 : index
    %c0_66 = arith.constant 0 : index
    %c15 = arith.constant 15 : index
    %98 = vector.load %arg3[%c0_65, %c0_66, %c15] : memref<1x4x21xf32, #tpu.memory_space<vmem>>, vector<1x4x1xf32>
    tpu.vector_store %arg3[%c0_65, %c0_66, %c15], %38 {strides = array<i32>} : memref<1x4x21xf32, #tpu.memory_space<vmem>>, vector<1x4x1xf32>,
    %c0_67 = arith.constant 0 : index
    %c0_68 = arith.constant 0 : index
    %c16 = arith.constant 16 : index
    %99 = vector.load %arg3[%c0_67, %c0_68, %c16] : memref<1x4x21xf32, #tpu.memory_space<vmem>>, vector<1x4x1xf32>
    tpu.vector_store %arg3[%c0_67, %c0_68, %c16], %41 {strides = array<i32>} : memref<1x4x21xf32, #tpu.memory_space<vmem>>, vector<1x4x1xf32>,
    %c0_69 = arith.constant 0 : index
    %c0_70 = arith.constant 0 : index
    %c17 = arith.constant 17 : index
    %100 = vector.load %arg3[%c0_69, %c0_70, %c17] : memref<1x4x21xf32, #tpu.memory_space<vmem>>, vector<1x4x1xf32>
    tpu.vector_store %arg3[%c0_69, %c0_70, %c17], %46 {strides = array<i32>} : memref<1x4x21xf32, #tpu.memory_space<vmem>>, vector<1x4x1xf32>,
    %c0_71 = arith.constant 0 : index
    %c0_72 = arith.constant 0 : index
    %c18 = arith.constant 18 : index
    %101 = vector.load %arg3[%c0_71, %c0_72, %c18] : memref<1x4x21xf32, #tpu.memory_space<vmem>>, vector<1x4x1xf32>
    tpu.vector_store %arg3[%c0_71, %c0_72, %c18], %49 {strides = array<i32>} : memref<1x4x21xf32, #tpu.memory_space<vmem>>, vector<1x4x1xf32>,
    %c0_73 = arith.constant 0 : index
    %c0_74 = arith.constant 0 : index
    %c19 = arith.constant 19 : index
    %102 = vector.load %arg3[%c0_73, %c0_74, %c19] : memref<1x4x21xf32, #tpu.memory_space<vmem>>, vector<1x4x1xf32>
    tpu.vector_store %arg3[%c0_73, %c0_74, %c19], %52 {strides = array<i32>} : memref<1x4x21xf32, #tpu.memory_space<vmem>>, vector<1x4x1xf32>,
    %c0_75 = arith.constant 0 : index
    %c0_76 = arith.constant 0 : index
    %c20 = arith.constant 20 : index
    %103 = vector.load %arg3[%c0_75, %c0_76, %c20] : memref<1x4x21xf32, #tpu.memory_space<vmem>>, vector<1x4x1xf32>
    tpu.vector_store %arg3[%c0_75, %c0_76, %c20], %55 {strides = array<i32>} : memref<1x4x21xf32, #tpu.memory_space<vmem>>, vector<1x4x1xf32>,
    return
  }
  func.func @transform_0(%arg0: i32, %arg1: i32) -> (i32, i32, i32, i32) {
    %c0_i32 = arith.constant 0 : i32
    %c0_i32_0 = arith.constant 0 : i32
    %c0_i32_1 = arith.constant 0 : i32
    return %arg0, %arg1, %c0_i32, %c0_i32_0 : i32, i32, i32, i32
  }
  func.func @transform_1(%arg0: i32, %arg1: i32) -> (i32, i32, i32) {
    %c0_i32 = arith.constant 0 : i32
    %c0_i32_0 = arith.constant 0 : i32
    return %arg0, %arg1, %c0_i32 : i32, i32, i32
  }
}

</mosaic_0001>

<bundles_post_ra>
// kernel: tpu_custom_call.1
= control target key start
LH: loop header
LB: loop body
LE: loop exit
PB: predicated region body
PF: predicated region fallthrough
CT: control target
= control target key end

     0   :  { %6 = vsyncpa [#allocation3], 0  ;;  %s1003_s0 = inlined_call_operand.hbm [shape: f32[2,4,16,16], index: 0, kind: input, shape index: {}]   ;;  %s1004_s1 = inlined_call_operand.hbm [shape: f32[2,4,21], index: 1, kind: output, shape index: {}]  }
   0x1   :  { %8 = vsyncpa [#allocation3 + $0x1], 0 }
   0x2   :  { %9 = vsyncpa [#allocation4], 0 }
   0x3   :  { %11 = vsyncpa [#allocation4 + $0x1], 0  ;;  %s743_s6 = smov 0   ;;  %s745_s7 = smov 0  }
   0x4   :  { %s747_s8 = smov 0   ;;  %s749_s9 = smov 0  }
   0x5   :  { %s751_s10 = smov 0   ;;  %s753_s11 = smov 0  }
   0x6 LB: > { %s536_s12 = sadd.s32 4294967295, %s727_s11   ;;  %s537_s13 = sadd.s32 4294967294, %s727_s11   ;;  %s727_s11 = sphi %s753_s11, %s17_s11   ;;  %s723_s10 = sphi %s751_s10, %s1019_s10   ;;  %s719_s9 = sphi %s749_s9, %s1018_s9   ;;  %s715_s8 = sphi %s747_s8, %s1017_s8   ;;  %s711_s7 = sphi %s745_s7, %s1016_s7   ;;  %s707_s6 = sphi %s743_s6, %s1015_s6  }
   0x7   : > { %s29_s14 = sadd.s32 1, %s723_s10  ;;  %s38_s15 = sadd.s32 1, %s715_s8 }
   0x8   : > { %p31_p0 = scmp.ge.s32.totalorder %s29_s14, 2  ;;  %p45_p1 = scmp.ne.s32.totalorder %s715_s8, %s711_s7 }
   0x9   : > { %p46_p2 = scmp.eq.s32.totalorder %s727_s11, 0  ;;  %p51_p3 = scmp.ne.s32.totalorder %s711_s7, %s707_s6 }
   0xa   : > { %s1021_s14 = smov (%p31_p0, %s29_s14), 0  ;;  %p52_p5 = scmp.eq.s32.totalorder %s536_s12, 0 }
   0xb   : > { %p784_p4 = por %p46_p2, %p45_p1  ;;  %s33_s17 = ssub.s32 %s723_s10, %s1021_s14 }
   0xc   : > { %p77_p6 = scmp.eq.s32.totalorder %s536_s12, 1  ;;  %p36_p7 = scmp.eq.s32.totalorder %s33_s17, 0 }
   0xd   : > { %p790_p8 = por %p52_p5, %p51_p3  ;;  %p83_p10 = scmp.eq.s32.totalorder %s537_s13, 1 }
   0xe   : > { %p794_p9 = por %p77_p6, %p45_p1  ;;  %p563_p13 = scmp.lt.s32.totalorder %s727_s11, 2 }
   0xf   : > { %s799_s20 = scalar_select %p36_p7, %s715_s8, %s38_s15  }
  0x10   : > { %s1008_s19 = scalar_select %p794_p9, 1, 0 }
  0x11   : > { %p801_p11 = por %p83_p10, %p51_p3  ;;  %s103_s22 = sand.u32 1, %s715_s8  }
  0x12   : > { %s540_s23 = sshll.u32 %s103_s22, 6  ;;  %s550_s24 = sshll.u32 %s723_s10, 10 }
  0x13   : > { %s1009_s21 = scalar_select %p801_p11, 1, 0 }
  0x14   : > { %s812_s27 = scalar_lea.hbm %s1003_s0, %s550_s24  ;;  %s107_s28 = scalar_lea.vmem [#allocation2], %s540_s23 }
  0x15   : > { %s117_s29 = sshll.u32 %s107_s28, 4  ;;  %p818_p0 = pnand %p563_p13, %p784_p4  ;;  %s814_s29 = int_to_ptr.vmem [resolvable:$true] %s117_s29 }
  0x16   : > { %s823_s2 = scalar_lea.sflag [#allocation3], %s103_s22  ;;  %s615_s3 = scalar_lea.hbm %s812_s27, 1024 }
  0x17   : > { %p616_p2 = scmp.ne.s32.totalorder %s812_s27, %s615_s3  ;;  %p617_p3 = pneg %p818_p0 }
  0x18   : > { %s620_s12 = scalar_lea.hbm %s1003_s0, 2048  ;;  %p621_p4 = scmp.lt.u32.totalorder %s812_s27, %s1003_s0 }
  0x19   : > { %p618_p5 = pnand %p617_p3, %p616_p2  ;;  %p622_p7 = scmp.lt.u32.totalorder %s620_s12, %s615_s3 }
  0x1a   : > { %p624_p13 = scmp.lt.u32.totalorder %s615_s3, %s812_s27 }
  0x1b   : > { %p619_p6 = pneg %p618_p5  ;;  %p623_p10 = por %p622_p7, %p621_p4 }
  0x1d   : > { %p625_p12 = por %p624_p13, %p623_p10 }
  0x1f   : > { %p626_p1 = pnand %p625_p12, %p619_p6 }
  0x21   : > { %629 = shalt.err (!%p626_p1)
}
  0x22   : > { %s630_s16 = scalar_lea.vmem %s814_s29, 1024  ;;  %s729_s17 = smov [#allocation2]  }
  0x23   : > { %p631_p2 = scmp.ne.s32.totalorder %s814_s29, %s630_s16  ;;  %s635_s22 = sshll.u32 %s729_s17, 4  ;;  %s636_s22 = int_to_ptr.vmem [resolvable:$false] %s635_s22 }
  0x24   : > { %s637_s23 = scalar_lea.vmem %s636_s22, 2048  ;;  %p638_p9 = scmp.lt.s32.totalorder %s814_s29, %s636_s22 }
  0x25   : > { %p633_p5 = pnand %p631_p2, %p617_p3  ;;  %p639_p4 = scmp.lt.s32.totalorder %s637_s23, %s630_s16 }
  0x27   : > { %p634_p11 = pneg %p633_p5  ;;  %p640_p7 = por %p639_p4, %p638_p9 }
  0x29   : > { %p641_p10 = pnand %p640_p7, %p634_p11 }
  0x2b   : > { %644 = shalt.err (!%p641_p10)
}
  0x2c   : > { %s730_s24 = smov 128   ;;  %s731_s25 = smov 8  }
  0x2d   : > { %558 = dma.hbm_to_vmem [thread:$0]  (!%p818_p0), %s812_s27, 1024, %s814_s29, %s823_s2, %s730_s24, %s730_s24, %s731_s25  }
  0x2e   : > { %p125_p12 = scmp.lt.s32.totalorder %s727_s11, 3  ;;  %p1011_p1 = scmp.ge.s32.totalorder %s727_s11, 1 }
  0x30   : > { %p126_p3 = pnand %p1011_p1, %p125_p12 }
  0x31   : > { %s855_s26 = sand.u32 (!%p126_p3), 1, %s711_s7  }
  0x32   : > { %129 = sbr.rel (%p126_p3) target bundleno = 287 (0x11f), region = 24  ;;  %s544_s28 = sshll.u32 (!%p126_p3), %s855_s26, 6 }
  0x33   : > { %s132_s3 = scalar_lea.sflag (!%p126_p3), [#allocation3], %s855_s26  ;;  %s859_s4 = scalar_lea.vmem (!%p126_p3), [#allocation2], %s544_s28 }
  0x39   : > { %698 = dma.done.wait (%p790_p8), %s132_s3, 1024  }
  0x3a   : > { %700 = vsyncadd (%p790_p8), %s132_s3, 4294966272  ;;  %vm159_vm0 = vcmask 125952   ;;  %v155_v0 = vld [vmem:[%s859_s4] sm:$0xf]  ;;  %v156_v1 = vld [vmem:[%s859_s4 + $0x10] sm:$0xf] }
  0x3b   : > { %v157_v2 = vld [vmem:[%s859_s4 + $0x20] sm:$0xf]  ;;  %v158_v3 = vld [vmem:[%s859_s4 + $0x30] sm:$0xf]  ;;  %v160_v4 = vsel %vm159_vm0, %v155_v0, -inf  ;;  %v167_v5 = vsel %vm159_vm0, %v156_v1, -inf }
  0x3c   : > { %v174_v6 = vsel %vm159_vm0, %v157_v2, -inf  ;;  %v161_v7 = vrot.slane %v160_v4, 4  ;;  %v168_v8 = vrot.slane %v167_v5, 4  ;;  %v181_v10 = vsel %vm159_vm0, %v158_v3, -inf  ;;  %v215_v11 = vld [vmem:[%s859_s4 + $0x4] sm:$0xf] }
  0x3d   : > { %v175_v9 = vrot.slane %v174_v6, 4  ;;  %v182_v12 = vrot.slane %v181_v10, 4  ;;  %vm192_vm1 = vcmask 1041409   ;;  %v216_v13 = vld [vmem:[%s859_s4 + $0x14] sm:$0xf]  ;;  %v219_v15 = vsel %vm159_vm0, %v215_v11, -inf }
  0x3e   : > { %v217_v14 = vld [vmem:[%s859_s4 + $0x24] sm:$0xf]  ;;  %v162_v16 = vmax.f32 %v160_v4, %v161_v7  ;;  %v169_v17 = vmax.f32 %v167_v5, %v168_v8  ;;  %vm194_vm2 = vcmask 1042434   ;;  %v218_v19 = vld [vmem:[%s859_s4 + $0x34] sm:$0xf]  ;;  %v220_v20 = vrot.slane %v219_v15, 4 }
  0x3f   : > { %v176_v18 = vmax.f32 %v174_v6, %v175_v9  ;;  %v183_v21 = vmax.f32 %v181_v10, %v182_v12  ;;  %vm196_vm3 = vcmask 1043459   ;;  %v226_v22 = vsel %vm159_vm0, %v216_v13, -inf  ;;  %v267_v45 = vld [vmem:[%s859_s4 + $0x8] sm:$0xf]  ;;  %v268_v50 = vld [vmem:[%s859_s4 + $0x18] sm:$0xf] }
  0x40   : > { %v233_v23 = vsel %vm159_vm0, %v217_v14, -inf  ;;  %v240_v24 = vsel %vm159_vm0, %v218_v19, -inf  ;;  %v163_v25 = vrot.slane %v162_v16, 2  ;;  %v170_v26 = vrot.slane %v169_v17, 2  ;;  %v269_v59 = vld [vmem:[%s859_s4 + $0x28] sm:$0xf] }
  0x41   : > { %v177_v27 = vrot.slane %v176_v18, 2  ;;  %vm207_vm4 = vcmask 93248   ;;  %vm199_vm5 = vcmask 27648   ;;  %vm211_vm6 = vcmask 126048   ;;  %v270_v4 = vld [vmem:[%s859_s4 + $0x38] sm:$0xf] }
  0x42   : > { %vm203_vm7 = vcmask 60448   ;;  %v221_v28 = vmax.f32 %v219_v15, %v220_v20  ;;  %v184_v29 = vrot.slane %v183_v21, 2  ;;  %v227_v30 = vrot.slane %v226_v22, 4  ;;  %v319_v9 = vld [vmem:[%s859_s4 + $0xc] sm:$0xf]  ;;  %s545_s18 = sshll.u32 %s855_s26, 2 }
  0x43   : > { %v234_v31 = vrot.slane %v233_v23, 4  ;;  %v241_v32 = vrot.slane %v240_v24, 4  ;;  %v164_v33 = vmax.f32 %v162_v16, %v163_v25  ;;  %v171_v34 = vmax.f32 %v169_v17, %v170_v26  ;;  %s926_s27 = scalar_lea.vmem [#allocation5], %s545_s18  ;;  %s547_s29 = sshll.u32 %s719_s9, 6 }
  0x44   : > { %v178_v35 = vmax.f32 %v176_v18, %v177_v27  ;;  %v222_v36 = vrot.slane %v221_v28, 2  ;;  %v185_v37 = vmax.f32 %v183_v21, %v184_v29  ;;  %v228_v38 = vmax.f32 %v226_v22, %v227_v30  ;;  %v320_v18 = vld [vmem:[%s859_s4 + $0x1c] sm:$0xf]  ;;  %s454_s30 = sshll.u32 %s926_s27, 4  ;;  %s952_s12 = scalar_lea.hbm %s1004_s1, %s547_s29  ;;  %s954_s30 = int_to_ptr.vmem [resolvable:$true] %s454_s30 }
  0x45   : > { %v235_v39 = vmax.f32 %v233_v23, %v234_v31  ;;  %v242_v40 = vmax.f32 %v240_v24, %v241_v32  ;;  %v165_v41 = vrot.slane %v164_v33, 1  ;;  %v172_v42 = vrot.slane %v171_v34, 1  ;;  %s440_s13 = scalar_lea.sflag [#allocation4], %s855_s26  ;;  %s645_s9 = scalar_lea.vmem %s954_s30, 64 }
  0x46   : > { %v179_v43 = vrot.slane %v178_v35, 1  ;;  %v223_v44 = vmax.f32 %v221_v28, %v222_v36  ;;  %v186_v46 = vrot.slane %v185_v37, 1  ;;  %v229_v47 = vrot.slane %v228_v38, 2  ;;  %p646_p8 = scmp.ne.s32.totalorder %s954_s30, %s645_s9  ;;  %p1012_p9 = scmp.ne.s32.totalorder %s1008_s19, 0 }
  0x47   : > { %v236_v48 = vrot.slane %v235_v39, 2  ;;  %v243_v49 = vrot.slane %v242_v40, 2  ;;  %v166_v51 = vmax.f32 %v164_v33, %v165_v41  ;;  %v173_v52 = vmax.f32 %v171_v34, %v172_v42  ;;  %v321_v34 = vld [vmem:[%s859_s4 + $0x2c] sm:$0xf]  ;;  %s732_s15 = smov [#allocation5]  }
  0x48   : > { %v180_v53 = vmax.f32 %v178_v35, %v179_v43  ;;  %v224_v54 = vrot.slane %v223_v44, 1  ;;  %v187_v55 = vmax.f32 %v185_v37, %v186_v46  ;;  %v230_v56 = vmax.f32 %v228_v38, %v229_v47  ;;  %v322_v35 = vld [vmem:[%s859_s4 + $0x3c] sm:$0xf]  ;;  %p647_p11 = pnand %p646_p8, %p1012_p9  ;;  %s649_s16 = sshll.u32 %s732_s15, 4  ;;  %s650_s16 = int_to_ptr.vmem [resolvable:$false] %s649_s16 }
  0x49   : > { %v237_v57 = vmax.f32 %v235_v39, %v236_v48  ;;  %v244_v58 = vmax.f32 %v242_v40, %v243_v49  ;;  %v193_v60 = vsel %vm192_vm1, %v173_v52, %v166_v51  ;;  %v271_v62 = vsel %vm159_vm0, %v267_v45, -inf  ;;  %s651_s17 = scalar_lea.vmem %s650_s16, 128  ;;  %p652_p6 = scmp.lt.s32.totalorder %s954_s30, %s650_s16 }
  0x4a   : > { %v225_v61 = vmax.f32 %v223_v44, %v224_v54  ;;  %v278_v63 = vsel %vm159_vm0, %v268_v50, -inf  ;;  %v195_v0 = vsel %vm194_vm2, %v180_v53, %v193_v60  ;;  %v231_v1 = vrot.slane %v230_v56, 1  ;;  %p648_p0 = pneg %p647_p11  ;;  %p653_p13 = scmp.lt.s32.totalorder %s651_s17, %s645_s9 }
  0x4b   : > { %v238_v2 = vrot.slane %v237_v57, 1  ;;  %v245_v3 = vrot.slane %v244_v58, 1  ;;  %v197_v5 = vsel %vm196_vm3, %v187_v55, %v195_v0  ;;  %v272_v6 = vrot.slane %v271_v62, 4 }
  0x4c   : > { %v279_v7 = vrot.slane %v278_v63, 4  ;;  %v285_v8 = vsel %vm159_vm0, %v269_v59, -inf  ;;  %v208_v10 = vsel %vm207_vm4, %v197_v5, -inf  ;;  %v200_v11 = vsel %vm199_vm5, %v197_v5, -inf  ;;  %p654_p2 = por %p653_p13, %p652_p6 }
  0x4d   : > { %v212_v12 = vsel %vm211_vm6, %v197_v5, -inf  ;;  %v204_v13 = vsel %vm203_vm7, %v197_v5, -inf  ;;  %209 = vmax.xlane.f32.xlu1 %v208_v10  ;;  %201 = vmax.xlane.f32.xlu0 %v200_v11  ;;  %v232_v14 = vmax.f32 %v230_v56, %v231_v1  ;;  %v239_v15 = vmax.f32 %v237_v57, %v238_v2 }
  0x4e   : > { %v246_v16 = vmax.f32 %v244_v58, %v245_v3  ;;  %v286_v17 = vrot.slane %v285_v8, 4  ;;  %v273_v19 = vmax.f32 %v271_v62, %v272_v6  ;;  %v280_v20 = vmax.f32 %v278_v63, %v279_v7  ;;  %p655_p5 = pnand %p654_p2, %p648_p0 }
  0x4f   : > { %v292_v21 = vsel %vm159_vm0, %v270_v4, -inf  ;;  %v323_v22 = vsel %vm159_vm0, %v319_v9, -inf  ;;  %v251_v23 = vsel %vm192_vm1, %v232_v14, %v225_v61  ;;  %v330_v30 = vsel %vm159_vm0, %v320_v18, -inf }
  0x50   : > { %v287_v24 = vmax.f32 %v285_v8, %v286_v17  ;;  %v293_v25 = vrot.slane %v292_v21, 4  ;;  %v324_v26 = vrot.slane %v323_v22, 4  ;;  %v252_v27 = vsel %vm194_vm2, %v239_v15, %v251_v23 }
  0x51   : > { %v274_v28 = vrot.slane %v273_v19, 2  ;;  %v281_v29 = vrot.slane %v280_v20, 2  ;;  %213 = vmax.xlane.f32.xlu1 %v212_v12  ;;  %205 = vmax.xlane.f32.xlu0 %v204_v13  ;;  %v253_v31 = vsel %vm196_vm3, %v246_v16, %v252_v27  ;;  %v331_v46 = vrot.slane %v330_v30, 4 }
  0x52   : > { %v288_v32 = vrot.slane %v287_v24, 2  ;;  %v294_v33 = vmax.f32 %v292_v21, %v293_v25  ;;  %v325_v36 = vmax.f32 %v323_v22, %v324_v26  ;;  %v255_v37 = vsel %vm199_vm5, %v253_v31, -inf }
  0x53   : > { %v258_v38 = vsel %vm203_vm7, %v253_v31, -inf  ;;  %v261_v39 = vsel %vm207_vm4, %v253_v31, -inf  ;;  %v264_v40 = vsel %vm211_vm6, %v253_v31, -inf  ;;  %v275_v41 = vmax.f32 %v273_v19, %v274_v28 }
  0x54   : > { %v282_v42 = vmax.f32 %v280_v20, %v281_v29  ;;  %v289_v43 = vmax.f32 %v287_v24, %v288_v32  ;;  %v295_v44 = vrot.slane %v294_v33, 2  ;;  %v326_v45 = vrot.slane %v325_v36, 2 }
  0x55   : > { %v337_v47 = vsel %vm159_vm0, %v321_v34, -inf  ;;  %v344_v48 = vsel %vm159_vm0, %v322_v35, -inf  ;;  %256 = vmax.xlane.f32.xlu0 %v255_v37  ;;  %259 = vmax.xlane.f32.xlu1 %v258_v38  ;;  %v276_v49 = vrot.slane %v275_v41, 1  ;;  %v332_v54 = vmax.f32 %v330_v30, %v331_v46 }
  0x56   : > { %v283_v50 = vrot.slane %v282_v42, 1  ;;  %v290_v51 = vrot.slane %v289_v43, 1  ;;  %v296_v52 = vmax.f32 %v294_v33, %v295_v44  ;;  %v327_v53 = vmax.f32 %v325_v36, %v326_v45 }
  0x57   : > { %v338_v55 = vrot.slane %v337_v47, 4  ;;  %v345_v56 = vrot.slane %v344_v48, 4  ;;  %v277_v57 = vmax.f32 %v275_v41, %v276_v49  ;;  %v333_v61 = vrot.slane %v332_v54, 2 }
  0x58   : > { %v284_v58 = vmax.f32 %v282_v42, %v283_v50  ;;  %v291_v59 = vmax.f32 %v289_v43, %v290_v51  ;;  %v297_v60 = vrot.slane %v296_v52, 1  ;;  %v328_v2 = vrot.slane %v327_v53, 1 }
  0x59   : > { %v339_v62 = vmax.f32 %v337_v47, %v338_v55  ;;  %v346_v63 = vmax.f32 %v344_v48, %v345_v56  ;;  %262 = vmax.xlane.f32.xlu0 %v261_v39  ;;  %265 = vmax.xlane.f32.xlu1 %v264_v40  ;;  %v334_v4 = vmax.f32 %v332_v54, %v333_v61  ;;  %vm386_vm8 = vcmask 3072  }
  0x5a   : > { %v298_v0 = vmax.f32 %v296_v52, %v297_v60  ;;  %v303_v1 = vsel %vm192_vm1, %v284_v58, %v277_v57  ;;  %v329_v10 = vmax.f32 %v327_v53, %v328_v2  ;;  %vm390_vm9 = vcmask 11272  }
  0x5b   : > { %v304_v3 = vsel %vm194_vm2, %v291_v59, %v303_v1  ;;  %v340_v5 = vrot.slane %v339_v62, 2  ;;  %v347_v7 = vrot.slane %v346_v63, 2  ;;  %v335_v11 = vrot.slane %v334_v4, 1 }
  0x5c   : > { %v305_v6 = vsel %vm196_vm3, %v298_v0, %v304_v3  ;;  %vm395_vm10 = vcmask 19472   ;;  %vm400_vm11 = vcmask 27672   ;;  %vm405_vm12 = vcmask 35872  }
  0x5d   : > { %v307_v8 = vsel %vm199_vm5, %v305_v6, -inf  ;;  %v310_v9 = vsel %vm203_vm7, %v305_v6, -inf  ;;  %v341_v12 = vmax.f32 %v339_v62, %v340_v5  ;;  %v348_v13 = vmax.f32 %v346_v63, %v347_v7 }
  0x5e   : > { %308 = vmax.xlane.f32.xlu0 %v307_v8  ;;  %311 = vmax.xlane.f32.xlu1 %v310_v9  ;;  %v313_v14 = vsel %vm207_vm4, %v305_v6, -inf  ;;  %v316_v15 = vsel %vm211_vm6, %v305_v6, -inf  ;;  %v336_v16 = vmax.f32 %v334_v4, %v335_v11  ;;  %vm407_vm13 = vcmask 44072  }
  0x5f   : > { %v342_v17 = vrot.slane %v341_v12, 1  ;;  %v349_v18 = vrot.slane %v348_v13, 1  ;;  %vm409_vm14 = vcmask 52272   ;;  %vm411_vm15 = vcmask 60472  }
  0x60   : > { %v355_v21 = vsel %vm192_vm1, %v336_v16, %v329_v10  ;;  %vm413_vm0 = vcmask 68672   ;;  %vm415_vm1 = vcmask 76872  }
  0x61   : > { %v343_v19 = vmax.f32 %v341_v12, %v342_v17  ;;  %v350_v20 = vmax.f32 %v348_v13, %v349_v18 }
  0x62   : > { %314 = vmax.xlane.f32.xlu0 %v313_v14  ;;  %317 = vmax.xlane.f32.xlu1 %v316_v15 }
  0x63   : > { %v356_v22 = vsel %vm194_vm2, %v343_v19, %v355_v21  ;;  %vm417_vm2 = vcmask 85072  }
  0x64   : > { %v357_v23 = vsel %vm196_vm3, %v350_v20, %v356_v22  ;;  %vm419_vm3 = vcmask 93272  }
  0x65   : > { %v359_v24 = vsel %vm199_vm5, %v357_v23, -inf  ;;  %v362_v25 = vsel %vm203_vm7, %v357_v23, -inf  ;;  %v365_v26 = vsel %vm207_vm4, %v357_v23, -inf  ;;  %v368_v27 = vsel %vm211_vm6, %v357_v23, -inf }
  0x66   : > { %360 = vmax.xlane.f32.xlu0 %v359_v24  ;;  %363 = vmax.xlane.f32.xlu1 %v362_v25  ;;  %vm421_vm4 = vcmask 101472   ;;  %vm423_vm5 = vcmask 109672   ;;  %vm425_vm6 = vcmask 117872   ;;  %vm427_vm7 = vcmask 126072  }
  0x6a   : > { %366 = vmax.xlane.f32.xlu0 %v365_v26  ;;  %369 = vmax.xlane.f32.xlu1 %v368_v27 }
  0xda   : > { %v210_v28 = vpop.xlane.xlu1 %209  ;;  %v202_v29 = vpop.xlane.xlu0 %201 }
  0xde   : > { %v214_v30 = vpop.xlane.xlu1 %213  ;;  %v206_v31 = vpop.xlane.xlu0 %205 }
  0xdf   : > { %v371_v32 = vmax.f32 %v202_v29, %v206_v31  ;;  %v392_v54 = vmax.f32 %v210_v28, %v214_v30 }
  0xe1   : > { %v372_v33 = vmax.f32 %v371_v32, %v210_v28 }
  0xe2   : > { %v257_v34 = vpop.xlane.xlu0 %256  ;;  %v260_v35 = vpop.xlane.xlu1 %259 }
  0xe3   : > { %v373_v36 = vmax.f32 %v372_v33, %v214_v30  ;;  %v388_v56 = vmax.f32 %v371_v32, %v257_v34 }
  0xe5   : > { %v374_v37 = vmax.f32 %v373_v36, %v257_v34  ;;  %v389_v2 = vmax.f32 %v388_v56, %v260_v35 }
  0xe6   : > { %v263_v38 = vpop.xlane.xlu0 %262  ;;  %v266_v39 = vpop.xlane.xlu1 %265 }
  0xe7   : > { %v375_v40 = vmax.f32 %v374_v37, %v260_v35  ;;  %v393_v59 = vmax.f32 %v392_v54, %v263_v38 }
  0xe9   : > { %v376_v41 = vmax.f32 %v375_v40, %v263_v38  ;;  %v394_v3 = vmax.f32 %v393_v59, %v266_v39 }
  0xeb   : > { %v309_v42 = vpop.xlane.xlu0 %308  ;;  %v312_v43 = vpop.xlane.xlu1 %311  ;;  %v377_v44 = vmax.f32 %v376_v41, %v266_v39 }
  0xec   : > { %v397_v57 = vmax.f32 %v309_v42, %v312_v43 }
  0xed   : > { %v378_v45 = vmax.f32 %v377_v44, %v309_v42 }
  0xef   : > { %v315_v46 = vpop.xlane.xlu0 %314  ;;  %v318_v47 = vpop.xlane.xlu1 %317  ;;  %v379_v48 = vmax.f32 %v378_v45, %v312_v43 }
  0xf0   : > { %v402_v60 = vmax.f32 %v315_v46, %v318_v47 }
  0xf1   : > { %v380_v49 = vmax.f32 %v379_v48, %v315_v46 }
  0xf3   : > { %v381_v50 = vmax.f32 %v380_v49, %v318_v47  ;;  %v361_v51 = vpop.xlane.xlu0 %360  ;;  %v364_v52 = vpop.xlane.xlu1 %363 }
  0xf4   : > { %v398_v62 = vmax.f32 %v397_v57, %v361_v51 }
  0xf5   : > { %v382_v53 = vmax.f32 %v381_v50, %v361_v51 }
  0xf6   : > { %v399_v4 = vmax.f32 %v398_v62, %v364_v52 }
  0xf7   : > { %v383_v55 = vmax.f32 %v382_v53, %v364_v52  ;;  %v367_v58 = vpop.xlane.xlu0 %366  ;;  %v370_v63 = vpop.xlane.xlu1 %369 }
  0xf8   : > { %v403_v0 = vmax.f32 %v402_v60, %v367_v58 }
  0xf9   : > { %v384_v61 = vmax.f32 %v383_v55, %v367_v58 }
  0xfa   : > { %v404_v5 = vmax.f32 %v403_v0, %v370_v63 }
  0xfb   : > { %v385_v1 = vmax.f32 %v384_v61, %v370_v63 }
  0xfd   : > { %387 = vst.msk [vmem:[%s926_s27] sm:$0xf] %vm386_vm8, %v385_v1  ;;  %vm429_vm8 = vcmask 134272  }
  0xfe   : > { %391 = vst.msk [vmem:[%s926_s27] sm:$0xf] %vm390_vm9, %v389_v2  ;;  %vm431_vm9 = vcmask 142472  }
  0xff   : > { %396 = vst.msk [vmem:[%s926_s27] sm:$0xf] %vm395_vm10, %v394_v3  ;;  %vm433_vm10 = vcmask 150672  }
 0x100   : > { %401 = vst.msk [vmem:[%s926_s27] sm:$0xf] %vm400_vm11, %v399_v4  ;;  %vm435_vm11 = vcmask 158872  }
 0x101   : > { %406 = vst.msk [vmem:[%s926_s27] sm:$0xf] %vm405_vm12, %v404_v5  ;;  %vm437_vm12 = vcmask 167072  }
 0x102   : > { %408 = vst.msk [vmem:[%s926_s27] sm:$0xf] %vm407_vm13, %v202_v29 }
 0x103   : > { %410 = vst.msk [vmem:[%s926_s27] sm:$0xf] %vm409_vm14, %v206_v31 }
 0x104   : > { %412 = vst.msk [vmem:[%s926_s27] sm:$0xf] %vm411_vm15, %v210_v28 }
 0x105   : > { %414 = vst.msk [vmem:[%s926_s27] sm:$0xf] %vm413_vm0, %v214_v30 }
 0x106   : > { %416 = vst.msk [vmem:[%s926_s27] sm:$0xf] %vm415_vm1, %v257_v34 }
 0x107   : > { %418 = vst.msk [vmem:[%s926_s27] sm:$0xf] %vm417_vm2, %v260_v35 }
 0x108   : > { %420 = vst.msk [vmem:[%s926_s27] sm:$0xf] %vm419_vm3, %v263_v38 }
 0x109   : > { %422 = vst.msk [vmem:[%s926_s27] sm:$0xf] %vm421_vm4, %v266_v39 }
 0x10a   : > { %424 = vst.msk [vmem:[%s926_s27] sm:$0xf] %vm423_vm5, %v309_v42 }
 0x10b   : > { %426 = vst.msk [vmem:[%s926_s27] sm:$0xf] %vm425_vm6, %v312_v43 }
 0x10c   : > { %428 = vst.msk [vmem:[%s926_s27] sm:$0xf] %vm427_vm7, %v315_v46 }
 0x10d   : > { %430 = vst.msk [vmem:[%s926_s27] sm:$0xf] %vm429_vm8, %v318_v47 }
 0x10e   : > { %432 = vst.msk [vmem:[%s926_s27] sm:$0xf] %vm431_vm9, %v361_v51 }
 0x10f   : > { %434 = vst.msk [vmem:[%s926_s27] sm:$0xf] %vm433_vm10, %v364_v52 }
 0x110   : > { %436 = vst.msk [vmem:[%s926_s27] sm:$0xf] %vm435_vm11, %v367_v58 }
 0x111   : > { %438 = vst.msk [vmem:[%s926_s27] sm:$0xf] %vm437_vm12, %v370_v63 }
 0x112   : > { %658 = shalt.err (!%p655_p5)
}
 0x113   : > { %s659_s22 = scalar_lea.hbm %s952_s12, 64  ;;  %s663_s25 = scalar_lea.hbm %s1004_s1, 128 }
 0x114   : > { %p660_p4 = scmp.ne.s32.totalorder %s952_s12, %s659_s22  ;;  %p664_p12 = scmp.lt.u32.totalorder %s952_s12, %s1004_s1 }
 0x115   : > { %p665_p1 = scmp.lt.u32.totalorder %s663_s25, %s659_s22  ;;  %p667_p8 = scmp.lt.u32.totalorder %s659_s22, %s952_s12 }
 0x116   : > { %p661_p7 = pnand %p660_p4, %p1012_p9 }
 0x117   : > { %p666_p3 = por %p665_p1, %p664_p12 }
 0x118   : > { %p662_p10 = pneg %p661_p7 }
 0x119   : > { %p668_p11 = por %p667_p8, %p666_p3 }
 0x11b   : > { %p669_p0 = pnand %p668_p11, %p662_p10 }
 0x11d   : > { %672 = shalt.err (!%p669_p0)
}
 0x11e   : > { %553 = dma.vmem_to_hbm [thread:$0]  (%p1012_p9), %s954_s30, 64, %s952_s12, %s440_s13  }
 0x11f PF: > { %s466_s3 = sand.u32 1, %s707_s6   ;;  %p1013_p6 = scmp.ne.s32.totalorder %s1009_s21, 0 }
 0x120   : > { %p1014_p13 = scmp.ge.s32.totalorder %s727_s11, 2  ;;  %s467_s4 = scalar_lea.sflag [#allocation4], %s466_s3 }
 0x122   : > { %p560_p2 = pnand %p1014_p13, %p1013_p6 }
 0x124   : > { %702 = dma.done.wait (!%p560_p2), %s467_s4, 64  }
 0x125   : > { %704 = vsyncadd (!%p560_p2), %s467_s4, 4294967232  ;;  %s17_s11 = sadd.s32 1, %s727_s11   ;;  %s1015_s6 = smov %s711_s7 }
 0x126   : > { %p14_p5 = scmp.ge.s32.totalorder %s17_s11, 4   ;;  %s1016_s7 = smov %s715_s8 }
 0x127   : > { %s1017_s8 = smov %s799_s20  ;;  %s1018_s9 = smov %s723_s10 }
 0x128   : > { %s1019_s10 = smov %s1021_s14  ;;  %16 = sbr.rel (!%p14_p5) target bundleno = 6 (0x6), region = 69 }
 0x12f   :  { %472 = vsyncpa [#allocation3], 1 }
 0x130   :  { %474 = vsyncpa [#allocation3 + $0x1], 1 }
 0x131   :  { %475 = vsyncpa [#allocation4], 1 }
 0x132   :  { %477 = vsyncpa [#allocation4 + $0x1], 1 }

</bundles_post_ra>
